<compile_context>
chip_gen: v6e
topology: v6e:2x2x1
jax: 0.10.0
libtpu: 0.0.40
codegen_flags: <defaults>
</compile_context>

<pallas_src>
from typing import NamedTuple

import jax
import jax.numpy as jnp
from jax.experimental import pallas as pl
from jax.experimental.pallas import tpu as pltpu

LANE = 128     # TPU vreg lane width (last dim)
SUBLANE = 8    # TPU vreg sublane width (second-to-last dim)


def _round_up(x: int, m: int) -> int:
    return ((x + m - 1) // m) * m


class LinearParams(NamedTuple):
    """Pre-transposed, lane-padded Linear parameters (prepared once)."""
    wt: jax.Array    # [in_dim_padded, out_dim_padded], compute dtype
    b: jax.Array     # [1, out_dim_padded], float32 (zero beyond out_dim)
    out_dim: int     # logical number of output features


def prepare_linear_params(weight, bias, *, compute_dtype=jnp.float32,
                          in_pad_to=1, out_pad_to=LANE) -> LinearParams:
    """One-time parameter prep: transpose to [in, out], zero-pad the output
    (and optionally input) axis to 128 lanes, optionally cast to bf16 for the
    MXU. Done at load time, so nothing is re-transposed per forward call."""
    out_dim, in_dim = weight.shape          # PyTorch nn.Linear convention
    in_p = _round_up(in_dim, in_pad_to)
    out_p = _round_up(out_dim, out_pad_to)
    wt = jnp.zeros((in_p, out_p), compute_dtype)
    wt = wt.at[:in_dim, :out_dim].set(jnp.asarray(weight, compute_dtype).T)
    b = jnp.zeros((1, out_p), jnp.float32)
    b = b.at[:, :out_dim].set(jnp.asarray(bias, jnp.float32))
    return LinearParams(wt=wt, b=b, out_dim=int(out_dim))


def _pick_tile_m(batch: int, tile_m) -> int:
    if tile_m is None:
        # Multiple of 8 sublanes; cap keeps double-buffered tiles tiny vs VMEM.
        # (Pass tile_m=128 on v5e to match its 4x128x128 MXU.)
        tile_m = min(256, _round_up(batch, SUBLANE))
    assert tile_m % SUBLANE == 0
    return tile_m


def _pad_rows(x, rows: int):
    if x.shape[0] == rows:
        return x
    return jnp.zeros((rows,) + x.shape[1:], x.dtype).at[: x.shape[0]].set(x)


def _linear_kernel(x_ref, wt_ref, b_ref, o_ref):
    # x tile [TILE_M, K], wt [K, Npad], b [1, Npad] -> o [TILE_M, Npad].
    x = x_ref[...].astype(wt_ref.dtype)               # optional bf16 MXU feed
    acc = jnp.dot(x, wt_ref[...], preferred_element_type=jnp.float32)
    o_ref[...] = (acc + b_ref[...]).astype(o_ref.dtype)


def classifier_forward(x, p: LinearParams, *, tile_m=None):
    """Classifier.forward: logits = x @ W^T + b, returns [batch, num_classes]."""
    batch, in_dim = x.shape
    k, n_pad = p.wt.shape
    assert k == in_dim, (k, in_dim)

    tile_m = _pick_tile_m(batch, tile_m)
    batch_pad = _round_up(batch, tile_m)
    xp = _pad_rows(x, batch_pad)

    itemsize = jnp.dtype(x.dtype).itemsize
    cost = pl.CostEstimate(
        flops=2 * batch_pad * in_dim * n_pad,
        transcendentals=0,
        bytes_accessed=(xp.size * itemsize
                        + p.wt.size * jnp.dtype(p.wt.dtype).itemsize
                        + p.b.size * 4
                        + batch_pad * n_pad * itemsize),
    )

    out = pl.pallas_call(
        _linear_kernel,
        out_shape=jax.ShapeDtypeStruct((batch_pad, n_pad), x.dtype),
        grid=(batch_pad // tile_m,),
        in_specs=[
            pl.BlockSpec((tile_m, in_dim), lambda i: (i, 0)),
            pl.BlockSpec((in_dim, n_pad), lambda i: (0, 0)),
            pl.BlockSpec((1, n_pad), lambda i: (0, 0)),
        ],
        out_specs=pl.BlockSpec((tile_m, n_pad), lambda i: (i, 0)),
        compiler_params=pltpu.CompilerParams(
            dimension_semantics=("parallel",)),
        cost_estimate=cost,
    )(xp, p.wt, p.b)

    # Slice away lane/row padding (fuses into downstream consumers).
    return out[:batch, : p.out_dim]


def _fused_fc_classifier_kernel(f_ref, wet_ref, be_ref, wct_ref, bc_ref,
                                z_ref, o_ref):
    # Encoder's final Linear with the classifier fused as an epilogue.
    f = f_ref[...].astype(wet_ref.dtype)
    z = jnp.dot(f, wet_ref[...], preferred_element_type=jnp.float32) + be_ref[...]
    z_ref[...] = z.astype(z_ref.dtype)
    logits = jnp.dot(z.astype(wct_ref.dtype), wct_ref[...],
                     preferred_element_type=jnp.float32) + bc_ref[...]
    o_ref[...] = logits.astype(o_ref.dtype)


def encoder_fc_classifier_forward(feat, enc_p: LinearParams,
                                  cls_p: LinearParams, *, tile_m=None):
    """Fused: z = feat @ We^T + be ; logits = z @ Wc^T + bc (review item #8:
    fold the tiny classifier matmul into the encoder's last layer)."""
    batch, feat_dim = feat.shape
    kf, l_pad = enc_p.wt.shape
    kc, n_pad = cls_p.wt.shape
    assert kf == feat_dim and kc == l_pad, (kf, feat_dim, kc, l_pad)

    tile_m = _pick_tile_m(batch, tile_m)
    batch_pad = _round_up(batch, tile_m)
    fp = _pad_rows(feat, batch_pad)

    itemsize = jnp.dtype(feat.dtype).itemsize
    cost = pl.CostEstimate(
        flops=2 * batch_pad * (feat_dim * l_pad + l_pad * n_pad),
        transcendentals=0,
        bytes_accessed=(fp.size * itemsize
                        + enc_p.wt.size * jnp.dtype(enc_p.wt.dtype).itemsize
                        + cls_p.wt.size * jnp.dtype(cls_p.wt.dtype).itemsize
                        + (enc_p.b.size + cls_p.b.size) * 4
                        + batch_pad * (l_pad + n_pad) * itemsize),
    )

    z, logits = pl.pallas_call(
        _fused_fc_classifier_kernel,
        out_shape=(
            jax.ShapeDtypeStruct((batch_pad, l_pad), feat.dtype),
            jax.ShapeDtypeStruct((batch_pad, n_pad), feat.dtype),
        ),
        grid=(batch_pad // tile_m,),
        in_specs=[
            pl.BlockSpec((tile_m, feat_dim), lambda i: (i, 0)),
            pl.BlockSpec((feat_dim, l_pad), lambda i: (0, 0)),
            pl.BlockSpec((1, l_pad), lambda i: (0, 0)),
            pl.BlockSpec((l_pad, n_pad), lambda i: (0, 0)),
            pl.BlockSpec((1, n_pad), lambda i: (0, 0)),
        ],
        out_specs=(
            pl.BlockSpec((tile_m, l_pad), lambda i: (i, 0)),
            pl.BlockSpec((tile_m, n_pad), lambda i: (i, 0)),
        ),
        compiler_params=pltpu.CompilerParams(
            dimension_semantics=("parallel",)),
        cost_estimate=cost,
    )(fp, enc_p.wt, enc_p.b, cls_p.wt, cls_p.b)

    return z[:batch, : enc_p.out_dim], logits[:batch, : cls_p.out_dim]


if __name__ == "__main__":
    # Small, deterministic shapes consistent with the module.
    latent_dim, num_classes, batch = 32, 10, 8
    img_size = 32                                  # Encoder: 128*(img//8)^2
    feat_dim = 128 * (img_size // 8) ** 2          # = 2048

    key = jax.random.PRNGKey(0)
    kx, kf, kwc, kbc, kwe, kbe = jax.random.split(key, 6)

    c_bound = 1.0 / (latent_dim ** 0.5)
    Wc = jax.random.uniform(kwc, (num_classes, latent_dim), jnp.float32,
                            -c_bound, c_bound)
    bc = jax.random.uniform(kbc, (num_classes,), jnp.float32, -c_bound, c_bound)

    e_bound = 1.0 / (feat_dim ** 0.5)
    We = jax.random.uniform(kwe, (latent_dim, feat_dim), jnp.float32,
                            -e_bound, e_bound)
    be = jax.random.uniform(kbe, (latent_dim,), jnp.float32, -e_bound, e_bound)

    x = jax.random.normal(kx, (batch, latent_dim), jnp.float32)
    feat = jax.random.normal(kf, (batch, feat_dim), jnp.float32)

    HI = jax.lax.Precision.HIGHEST

    # --- standalone classifier head (f32 MXU compute) ----------------------
    cls_p = prepare_linear_params(Wc, bc)
    logits = classifier_forward(x, cls_p)
    jax.block_until_ready(logits)
    logits_ref = jnp.dot(x, Wc.T, precision=HI) + bc
    assert logits.shape == (batch, num_classes)
    assert jnp.allclose(logits, logits_ref, atol=1e-5, rtol=1e-5)

    # --- bf16-MXU variant (f32 accumulation kept) --------------------------
    cls_p_bf16 = prepare_linear_params(Wc, bc, compute_dtype=jnp.bfloat16)
    logits_bf16 = classifier_forward(x, cls_p_bf16)
    jax.block_until_ready(logits_bf16)
    assert jnp.allclose(logits_bf16, logits_ref, atol=5e-2, rtol=5e-2)

    # --- fused encoder-fc + classifier epilogue -----------------------------
    enc_p = prepare_linear_params(We, be)                    # out padded to 128
    cls_pf = prepare_linear_params(Wc, bc, in_pad_to=LANE)   # in padded to 128
    z, logits_f = encoder_fc_classifier_forward(feat, enc_p, cls_pf)
    jax.block_until_ready((z, logits_f))
    z_ref = jnp.dot(feat, We.T, precision=HI) + be
    logits_f_ref = jnp.dot(z_ref, Wc.T, precision=HI) + bc
    assert z.shape == (batch, latent_dim)
    assert logits_f.shape == (batch, num_classes)
    assert jnp.allclose(z, z_ref, atol=1e-3, rtol=1e-3)
    assert jnp.allclose(logits_f, logits_f_ref, atol=1e-3, rtol=1e-3)

    print("KERNEL_OK")
</pallas_src>

<mosaic_0001>
module attributes {stable_mosaic.version = 11 : i64} {
  func.func @_linear_kernel(%arg0: i32, %arg1: memref<8x32xf32, #tpu.memory_space<vmem>>, %arg2: memref<32x128xf32, #tpu.memory_space<vmem>>, %arg3: memref<1x128xf32, #tpu.memory_space<vmem>>, %arg4: memref<8x128xf32, #tpu.memory_space<vmem>>) attributes {dimension_semantics = [#tpu.dimension_semantics<parallel>], iteration_bounds = array<i64: 1>, scalar_prefetch = 0 : i64, scratch_operands = 0 : i64, tpu.core_type = #tpu.core_type<tc>, window_params = [{transform_indices = @transform_0, window_bounds = array<i64: 8, 32>}, {pipeline_mode = #tpu.pipeline_mode<synchronous>, transform_indices = @transform_1, window_bounds = array<i64: 32, 128>}, {pipeline_mode = #tpu.pipeline_mode<synchronous>, transform_indices = @transform_2, window_bounds = array<i64: 1, 128>}, {transform_indices = @transform_3, window_bounds = array<i64: 8, 128>}]} {
    %c0 = arith.constant 0 : index
    %c0_0 = arith.constant 0 : index
    %0 = vector.load %arg1[%c0, %c0_0] : memref<8x32xf32, #tpu.memory_space<vmem>>, vector<8x32xf32>
    %c0_1 = arith.constant 0 : index
    %c0_2 = arith.constant 0 : index
    %1 = vector.load %arg2[%c0_1, %c0_2] : memref<32x128xf32, #tpu.memory_space<vmem>>, vector<32x128xf32>
    %cst = arith.constant dense<0.000000e+00> : vector<8x128xf32>
    %2 = tpu.matmul %0, %1, %cst {dimension_numbers = #tpu.dot_dimension_numbers<[1], [0], [0], [1], [0, 0, 1, 1], [], []>} : vector<8x32xf32>, vector<32x128xf32>, vector<8x128xf32> -> vector<8x128xf32>
    %c0_3 = arith.constant 0 : index
    %c0_4 = arith.constant 0 : index
    %3 = vector.load %arg3[%c0_3, %c0_4] : memref<1x128xf32, #tpu.memory_space<vmem>>, vector<1x128xf32>
    %4 = vector.broadcast %3 : vector<1x128xf32> to vector<8x128xf32>
    %5 = arith.addf %2, %4 : vector<8x128xf32>
    %c0_5 = arith.constant 0 : index
    %c0_6 = arith.constant 0 : index
    %6 = vector.load %arg4[%c0_5, %c0_6] : memref<8x128xf32, #tpu.memory_space<vmem>>, vector<8x128xf32>
    tpu.vector_store %arg4[%c0_5, %c0_6], %5 {strides = array<i32>} : memref<8x128xf32, #tpu.memory_space<vmem>>, vector<8x128xf32>,
    return
  }
  func.func @transform_0(%arg0: i32) -> (i32, i32) {
    %c0_i32 = arith.constant 0 : i32
    %c0_i32_0 = arith.constant 0 : i32
    return %arg0, %c0_i32 : i32, i32
  }
  func.func @transform_1(%arg0: i32) -> (i32, i32) {
    %c0_i32 = arith.constant 0 : i32
    %c0_i32_0 = arith.constant 0 : i32
    %c0_i32_1 = arith.constant 0 : i32
    return %c0_i32, %c0_i32_0 : i32, i32
  }
  func.func @transform_2(%arg0: i32) -> (i32, i32) {
    %c0_i32 = arith.constant 0 : i32
    %c0_i32_0 = arith.constant 0 : i32
    %c0_i32_1 = arith.constant 0 : i32
    return %c0_i32, %c0_i32_0 : i32, i32
  }
  func.func @transform_3(%arg0: i32) -> (i32, i32) {
    %c0_i32 = arith.constant 0 : i32
    %c0_i32_0 = arith.constant 0 : i32
    return %arg0, %c0_i32 : i32, i32
  }
}

</mosaic_0001>

<bundles_post_ra>
// kernel: tpu_custom_call.1
= control target key start
LH: loop header
LB: loop body
LE: loop exit
PB: predicated region body
PF: predicated region fallthrough
CT: control target
= control target key end

     0   :  { %8 = vsyncpa [#allocation3], 0  ;;  %s274_s0 = inlined_call_operand.hbm [shape: f32[8,32], index: 0, kind: input, shape index: {}]   ;;  %s275_s1 = inlined_call_operand.hbm [shape: f32[32,128], index: 1, kind: input, shape index: {}]   ;;  %s276_s2 = inlined_call_operand.vmem [shape: f32[1,128], index: 2, kind: input, shape index: {}]   ;;  %s277_s3 = inlined_call_operand.hbm [shape: f32[8,128], index: 3, kind: output, shape index: {}]  }
   0x1   :  { %9 = vsyncpa [#allocation6], 0 }
   0x2   :  { %10 = vsyncpa [#allocation4], 0  ;;  %s235_s12 = smov [#allocation2]   ;;  %s236_s14 = smov [#allocation5]  }
   0x3   :  { %s17_s13 = sshll.u32 %s235_s12, 4  ;;  %s26_s15 = sshll.u32 %s236_s14, 4  ;;  %s18_s13 = int_to_ptr.vmem [resolvable:$true] %s17_s13  ;;  %s27_s15 = int_to_ptr.vmem [resolvable:$true] %s26_s15 }
   0x4   :  { %s177_s16 = scalar_lea.vmem %s18_s13, 128  ;;  %p182_p1 = scmp.lt.s32.totalorder %s18_s13, %s18_s13 }
   0x5   :  { %p178_p0 = scmp.ne.s32.totalorder %s18_s13, %s177_s16  ;;  %p183_p2 = scmp.lt.s32.totalorder %s177_s16, %s177_s16 }
   0x7   :  { %p184_p3 = por %p183_p2, %p182_p1 }
   0x9   :  { %p185_p4 = pnand %p184_p3, %p178_p0 }
   0xb   :  { %188 = shalt.err (!%p185_p4)
}
   0xc   :  { %20 = dma.hbm_to_vmem [thread:$0]  %s274_s0, 128, %s18_s13, [#allocation3]  }
   0xd   :  { %s197_s19 = scalar_lea.vmem %s27_s15, 512  ;;  %p202_p6 = scmp.lt.s32.totalorder %s27_s15, %s27_s15 }
   0xe   :  { %p198_p5 = scmp.ne.s32.totalorder %s27_s15, %s197_s19  ;;  %p203_p7 = scmp.lt.s32.totalorder %s197_s19, %s197_s19 }
  0x10   :  { %p204_p8 = por %p203_p7, %p202_p6 }
  0x12   :  { %p205_p9 = pnand %p204_p8, %p198_p5 }
  0x14   :  { %208 = shalt.err (!%p205_p9)
}
  0x15   :  { %s237_s20 = smov 128   ;;  %s238_s21 = smov 8  }
  0x16   :  { %32 = dma.hbm_to_vmem [thread:$0]  %s275_s1, 512, %s27_s15, [#allocation6], %s237_s20, %s237_s20, %s238_s21  }
  0x17   :  { %229 = dma.done.wait [#allocation3], 128  }
  0x18   :  { %230 = vsyncadd [#allocation3], 4294967168 }
  0x19   :  { %231 = dma.done.wait [#allocation6], 512  }
  0x1a   :  { %232 = vsyncadd [#allocation6], 4294966784  ;;  %v239_v0 = vmov 0.0   ;;  %vm240_vm0 = vmmov 0   ;;  %v45_v1 = vld [vmem:[#allocation5 + $0x18] sm:$0xff]  ;;  %v44_v2 = vld [vmem:[#allocation5 + $0x10] sm:$0xff] }
  0x1b   :  { %151 = vmatprep.subr.mxu0 %v239_v0  ;;  %159 = vmatprep.mubr.msk.f32.mxu0 %vm240_vm0, %v239_v0  ;;  %v43_v3 = vld [vmem:[#allocation5 + $0x8] sm:$0xff]  ;;  %v42_v4 = vld [vmem:[#allocation5] sm:$0xff]  ;;  %v41_v5 = vld [vmem:[#allocation2] sm:$0xff]  ;;  %vm53_vm1 = vcmask 261120   ;;  %s241_s24 = smov [#allocation7]  }
  0x1c   :  { %152 = vmatpush3.msra.mxu0 %v45_v1  ;;  %v144_v6 = vld [vmem:[%s276_s2] ss:$0 sm:$0xff]  ;;  %s134_s25 = sshll.u32 %s241_s24, 4  ;;  %s135_s25 = int_to_ptr.vmem [resolvable:$true] %s134_s25 }
  0x1d   :  { %153 = vmatprep.subr.mxu0 %v239_v0  ;;  %s209_s26 = scalar_lea.vmem %s135_s25, 128  ;;  %p214_p11 = scmp.lt.s32.totalorder %s135_s25, %s135_s25 }
  0x1e   :  { %154 = vmatpush3.msra.mxu0 %v44_v2  ;;  %p210_p10 = scmp.ne.s32.totalorder %s135_s25, %s209_s26  ;;  %p215_p12 = scmp.lt.s32.totalorder %s209_s26, %s209_s26 }
  0x1f   :  { %155 = vmatprep.subr.mxu0 %v239_v0 }
  0x20   :  { %156 = vmatpush3.msra.mxu0 %v43_v3  ;;  %p216_p13 = por %p215_p12, %p214_p11 }
  0x21   :  { %157 = vmatprep.subr.mxu0 %v239_v0 }
  0x22   :  { %158 = vmatpush3.msra.mxu0 %v42_v4  ;;  %p217_p0 = pnand %p216_p13, %p210_p10 }
  0x23   :  { %160 = vmatmul.mubr.msk.f32.vlgmr.msra.gmra.mxu0 %vm53_vm1, %v41_v5 }
  0xe3   :  { %v123_v7 = vpop.f32.mrf.mxu0 }
  0xe4   :  { %v124_v8 = vadd.f32 %v144_v6, %v123_v7 }
  0xe5   :  { %v161_v9 = vpop.f32.mrf.mxu0 }
  0xe6   :  { %127 = vst [vmem:[#allocation7] sm:$0xff] %v124_v8 }
  0xe7   :  { %220 = shalt.err (!%p217_p0)
}
  0xe8   :  { %137 = dma.vmem_to_hbm [thread:$0]  %s135_s25, 128, %s277_s3, [#allocation4]  }
  0xe9   :  { %233 = dma.done.wait [#allocation4], 128  }
  0xea   :  { %234 = vsyncadd [#allocation4], 4294967168 }
  0xeb   :  { %141 = vsyncpa [#allocation3], 1 }
  0xec   :  { %142 = vsyncpa [#allocation6], 1 }
  0xed   :  { %143 = vsyncpa [#allocation4], 1 }

</bundles_post_ra>
